<compile_context>
chip_gen: v7x
topology: tpu7x:2x2x1
jax: 0.10.0
libtpu: 0.0.40
codegen_flags: <defaults>
</compile_context>

<pallas_src>
import functools

import jax
import jax.numpy as jnp
from jax import lax
from jax.experimental import pallas as pl
from jax.experimental.pallas import tpu as pltpu


def _gru_kernel(x_ref, wih_ref, whh_ref, bgi_ref, bhn_ref, m0_ref, m1_ref,
                out_ref, hn_ref, h_scr, gi_scr, *,
                hidden, batch_p, tile_t, t_real, max_unroll):
    """One time-chunk of the masked GRU.  Grid axis 0 == time chunks."""
    c = pl.program_id(0)
    n_chunks = pl.num_programs(0)
    H = hidden
    BP = batch_p
    has_tail = (t_real % tile_t) != 0          # static Python bool

    # h_0 = 0
    @pl.when(c == 0)
    def _():
        h_scr[...] = jnp.zeros_like(h_scr)

    # Hoisted input projection for the whole chunk (one MXU call), stored to
    # VMEM scratch so large chunks don't have to be held in registers:
    #   (tile_t*BP, I) @ (I, 3H) in bf16, accumulated in f32, biases fused.
    gi_scr[...] = (jnp.dot(x_ref[...], wih_ref[...],
                           preferred_element_type=jnp.float32)
                   + bgi_ref[...])

    whh = whh_ref[...]                         # (H, 3H)  bf16
    b_hn = bhn_ref[...]                        # (1, H)   f32

    def step(t, h):
        # t is either a static Python int (unrolled path) or a traced int32.
        row = t * BP if isinstance(t, int) else pl.multiple_of(t * BP, BP)
        gi = gi_scr[pl.ds(row, BP), :]                        # (BP, 3H) f32
        gh = jnp.dot(h.astype(jnp.bfloat16), whh,
                     preferred_element_type=jnp.float32)      # (BP, 3H) f32
        # One EUP sigmoid for r and z together (halves serial EUP pushes).
        rz = jax.nn.sigmoid(gi[:, :2 * H] + gh[:, :2 * H])
        r = rz[:, :H]
        z = rz[:, H:]
        n = jnp.tanh(gi[:, 2 * H:] + r * (gh[:, 2 * H:] + b_hn))
        h_new = n + z * (h - n)                               # == (1-z)*n + z*h
        if has_tail:
            # Zero-padded trailing time steps (last chunk only) must not
            # advance the recurrence: h_n must come from step t_real-1.
            h_new = jnp.where(c * tile_t + t < t_real, h_new, h)
        # Plain f32 row store into the chunk's VMEM output block; mask[0] is
        # applied once to the whole block after the loop.
        out_ref[pl.ds(row, BP), :] = h_new
        return h_new

    if tile_t <= max_unroll:
        h = h_scr[...]
        for t in range(tile_t):                # fully unrolled, static slices
            h = step(t, h)
    else:
        h = lax.fori_loop(0, tile_t, step, h_scr[...], unroll=max_unroll)

    h_scr[...] = h                             # carry to next chunk (f32)

    # res[0] = mask[0] * output_sequence: one broadcast + one wide store per
    # chunk instead of tile_t small masked multiplies/stores.
    out_ref[...] = out_ref[...] * m0_ref[...]

    # res[1] = mask[1].unsqueeze(1) * h_n — only the final state survives, so
    # write it exactly once, on the last chunk (constant-index resident block).
    @pl.when(c == n_chunks - 1)
    def _():
        hn_ref[...] = m1_ref[...] * h


def masked_gru_forward(x, w_ih, w_hh, b_ih, b_hh, mask0, mask1, tile_t=None):
    """x: (T, B, I) f32.  w_ih: (3H, I), w_hh: (3H, H), b_*: (3H,),
    mask0: (H,), mask1: (1, H).  Returns (out (T,B,H), h_n (1,B,H))."""
    T, B, I = x.shape
    H = w_hh.shape[1]

    # --- chunk / padding geometry -----------------------------------------
    # Large chunks amortize the ~0.35us per-grid-step overhead; the per-chunk
    # x / gi / out slabs stay well below VMEM on every generation
    # (v5e/v6e 128 MiB, v7x 64 MiB physical / 32 MiB scoped).
    if tile_t is None:
        tile_t = 8
        for cand in (128, 64, 32, 16, 8):
            if T >= cand:
                tile_t = cand
                break
    n_chunks = pl.cdiv(T, tile_t)
    T_pad = n_chunks * tile_t                  # zero-padded, guarded in-kernel
    BP = max(8, ((B + 7) // 8) * 8)            # sublane-aligned batch
    MAX_UNROLL = 8                             # bound on in-kernel unrolling

    # --- weight / bias / mask prep (wrapper-side, outside the kernel) ------
    w_ih_t = jnp.asarray(w_ih, jnp.float32).T.astype(jnp.bfloat16)   # (I, 3H)
    w_hh_t = jnp.asarray(w_hh, jnp.float32).T.astype(jnp.bfloat16)   # (H, 3H)
    b_ih_f = jnp.asarray(b_ih, jnp.float32)
    b_hh_f = jnp.asarray(b_hh, jnp.float32)
    # r/z biases combined; n-gate input bias kept; b_hh_n stays separate
    # because it must sit inside r * (gh_n + b_hh_n).
    b_gi = jnp.concatenate(
        [b_ih_f[:2 * H] + b_hh_f[:2 * H], b_ih_f[2 * H:]]).reshape(1, 3 * H)
    b_hn = b_hh_f[2 * H:].reshape(1, H)
    m0_2 = jnp.asarray(mask0, jnp.float32).reshape(1, H)
    m1_2 = jnp.asarray(mask1, jnp.float32).reshape(1, H)

    # Zero-pad time and batch, flatten time-major: row t*BP + b.  Lets the
    # kernel do one big 2-D matmul per chunk and one 2-D output slab per chunk.
    x_pad = jnp.zeros((T_pad, BP, I), jnp.float32)
    x_pad = x_pad.at[:T, :B, :].set(jnp.asarray(x, jnp.float32))
    x2d = x_pad.astype(jnp.bfloat16).reshape(T_pad * BP, I)

    kernel = functools.partial(_gru_kernel, hidden=H, batch_p=BP,
                               tile_t=tile_t, t_real=T, max_unroll=MAX_UNROLL)

    out2d, hn2d = pl.pallas_call(
        kernel,
        out_shape=(jax.ShapeDtypeStruct((T_pad * BP, H), jnp.float32),
                   jax.ShapeDtypeStruct((BP, H), jnp.float32)),
        grid_spec=pltpu.PrefetchScalarGridSpec(
            num_scalar_prefetch=0,
            grid=(n_chunks,),
            in_specs=[
                pl.BlockSpec((tile_t * BP, I), lambda c: (c, 0)),   # x chunk
                pl.BlockSpec((I, 3 * H), lambda c: (0, 0)),         # W_ih^T (bf16)
                pl.BlockSpec((H, 3 * H), lambda c: (0, 0)),         # W_hh^T (bf16)
                pl.BlockSpec((1, 3 * H), lambda c: (0, 0)),         # fused gi bias
                pl.BlockSpec((1, H), lambda c: (0, 0)),             # b_hh_n
                pl.BlockSpec((1, H), lambda c: (0, 0)),             # mask[0]
                pl.BlockSpec((1, H), lambda c: (0, 0)),             # mask[1]
            ],
            out_specs=(
                pl.BlockSpec((tile_t * BP, H), lambda c: (c, 0)),   # masked seq
                pl.BlockSpec((BP, H), lambda c: (0, 0)),            # masked h_n
            ),
            scratch_shapes=[
                pltpu.VMEM((BP, H), jnp.float32),                   # hidden carry
                pltpu.VMEM((tile_t * BP, 3 * H), jnp.float32),      # chunk gi
            ],
        ),
        compiler_params=pltpu.CompilerParams(
            dimension_semantics=("arbitrary",)),                    # recurrence
    )(x2d, w_ih_t, w_hh_t, b_gi, b_hn, m0_2, m1_2)

    out = out2d.reshape(T_pad, BP, H)[:T, :B]
    hn = hn2d[:B].reshape(1, B, H)
    return out, hn


def _reference(x, w_ih, w_hh, b_ih, b_hh, mask0, mask1):
    """Pure-JAX f32 GRU reference (PyTorch gate order r,z,n)."""
    T, B, I = x.shape
    H = w_hh.shape[1]

    def step(h, x_t):
        gi = x_t @ w_ih.T + b_ih
        gh = h @ w_hh.T + b_hh
        r = jax.nn.sigmoid(gi[:, :H] + gh[:, :H])
        z = jax.nn.sigmoid(gi[:, H:2 * H] + gh[:, H:2 * H])
        n = jnp.tanh(gi[:, 2 * H:] + r * gh[:, 2 * H:])
        h_new = (1.0 - z) * n + z * h
        return h_new, h_new

    h0 = jnp.zeros((B, H), jnp.float32)
    h_last, outs = jax.lax.scan(step, h0, x)
    res0 = mask0[None, None, :] * outs               # (T, B, H)
    res1 = mask1[:, None, :] * h_last[None]          # (1, B, H)
    return res0, res1


if __name__ == "__main__":
    T, B, I, H = 8, 2, 16, 32   # seq=8, batch=2, input=16, hidden=32

    key = jax.random.PRNGKey(0)
    ks = jax.random.split(key, 7)
    bound = 1.0 / jnp.sqrt(H)   # PyTorch nn.GRU default init: U(-1/sqrt(H), 1/sqrt(H))

    x = jax.random.normal(ks[0], (T, B, I), jnp.float32)
    w_ih = jax.random.uniform(ks[1], (3 * H, I), jnp.float32, -bound, bound)
    w_hh = jax.random.uniform(ks[2], (3 * H, H), jnp.float32, -bound, bound)
    b_ih = jax.random.uniform(ks[3], (3 * H,), jnp.float32, -bound, bound)
    b_hh = jax.random.uniform(ks[4], (3 * H,), jnp.float32, -bound, bound)

    # Deterministic pruning masks (binary).
    mask0 = (jax.random.uniform(ks[5], (H,)) > 0.3).astype(jnp.float32)    # for outs[0]
    mask1 = (jax.random.uniform(ks[6], (1, H)) > 0.3).astype(jnp.float32)  # for outs[1]

    out, hn = masked_gru_forward(x, w_ih, w_hh, b_ih, b_hh, mask0, mask1)
    jax.block_until_ready((out, hn))

    ref_out, ref_hn = _reference(x, w_ih, w_hh, b_ih, b_hh, mask0, mask1)
    assert out.shape == (T, B, H) and hn.shape == (1, B, H)
    assert jnp.allclose(out, ref_out, rtol=2e-2, atol=2e-2)
    assert jnp.allclose(hn, ref_hn, rtol=2e-2, atol=2e-2)

    print("KERNEL_OK")
</pallas_src>

<mosaic_0001>
module attributes {stable_mosaic.version = 11 : i64} {
  func.func @_gru_kernel(%arg0: i32, %arg1: memref<64x16xbf16, #tpu.memory_space<vmem>>, %arg2: memref<16x96xbf16, #tpu.memory_space<vmem>>, %arg3: memref<32x96xbf16, #tpu.memory_space<vmem>>, %arg4: memref<1x96xf32, #tpu.memory_space<vmem>>, %arg5: memref<1x32xf32, #tpu.memory_space<vmem>>, %arg6: memref<1x32xf32, #tpu.memory_space<vmem>>, %arg7: memref<1x32xf32, #tpu.memory_space<vmem>>, %arg8: memref<64x32xf32, #tpu.memory_space<vmem>>, %arg9: memref<8x32xf32, #tpu.memory_space<vmem>>, %arg10: memref<8x32xf32, #tpu.memory_space<vmem>>, %arg11: memref<64x96xf32, #tpu.memory_space<vmem>>) attributes {dimension_semantics = [#tpu.dimension_semantics<arbitrary>], iteration_bounds = array<i64: 1>, scalar_prefetch = 0 : i64, scratch_operands = 2 : i64, tpu.core_type = #tpu.core_type<tc>, window_params = [{transform_indices = @transform_0, window_bounds = array<i64: 64, 16>}, {pipeline_mode = #tpu.pipeline_mode<synchronous>, transform_indices = @transform_1, window_bounds = array<i64: 16, 96>}, {pipeline_mode = #tpu.pipeline_mode<synchronous>, transform_indices = @transform_2, window_bounds = array<i64: 32, 96>}, {pipeline_mode = #tpu.pipeline_mode<synchronous>, transform_indices = @transform_3, window_bounds = array<i64: 1, 96>}, {pipeline_mode = #tpu.pipeline_mode<synchronous>, transform_indices = @transform_4, window_bounds = array<i64: 1, 32>}, {pipeline_mode = #tpu.pipeline_mode<synchronous>, transform_indices = @transform_5, window_bounds = array<i64: 1, 32>}, {pipeline_mode = #tpu.pipeline_mode<synchronous>, transform_indices = @transform_6, window_bounds = array<i64: 1, 32>}, {transform_indices = @transform_7, window_bounds = array<i64: 64, 32>}, {pipeline_mode = #tpu.pipeline_mode<synchronous>, transform_indices = @transform_8, window_bounds = array<i64: 8, 32>}]} {
    %c0_i32 = arith.constant 0 : i32
    %0 = arith.cmpi eq, %arg0, %c0_i32 : i32
    %1 = arith.extui %0 : i1 to i32
    %c0_i32_0 = arith.constant 0 : i32
    %2 = arith.cmpi ne, %1, %c0_i32_0 : i32
    scf.if %2 {
      %cst_65 = arith.constant 0.000000e+00 : f32
      %214 = vector.broadcast %cst_65 : f32 to vector<8x32xf32>
      %c0_66 = arith.constant 0 : index
      %c0_67 = arith.constant 0 : index
      %215 = vector.load %arg10[%c0_66, %c0_67] : memref<8x32xf32, #tpu.memory_space<vmem>>, vector<8x32xf32>
      tpu.vector_store %arg10[%c0_66, %c0_67], %214 {strides = array<i32>} : memref<8x32xf32, #tpu.memory_space<vmem>>, vector<8x32xf32>,
    } else {
    }
    %c0 = arith.constant 0 : index
    %c0_1 = arith.constant 0 : index
    %3 = vector.load %arg1[%c0, %c0_1] : memref<64x16xbf16, #tpu.memory_space<vmem>>, vector<64x16xbf16>
    %c0_2 = arith.constant 0 : index
    %c0_3 = arith.constant 0 : index
    %4 = vector.load %arg2[%c0_2, %c0_3] : memref<16x96xbf16, #tpu.memory_space<vmem>>, vector<16x96xbf16>
    %cst = arith.constant dense<0.000000e+00> : vector<64x96xf32>
    %5 = tpu.matmul %3, %4, %cst {dimension_numbers = #tpu.dot_dimension_numbers<[1], [0], [0], [1], [0, 0, 1, 1], [], []>} : vector<64x16xbf16>, vector<16x96xbf16>, vector<64x96xf32> -> vector<64x96xf32>
    %c0_4 = arith.constant 0 : index
    %c0_5 = arith.constant 0 : index
    %6 = vector.load %arg4[%c0_4, %c0_5] : memref<1x96xf32, #tpu.memory_space<vmem>>, vector<1x96xf32>
    %7 = vector.broadcast %6 : vector<1x96xf32> to vector<64x96xf32>
    %8 = arith.addf %5, %7 : vector<64x96xf32>
    %c0_6 = arith.constant 0 : index
    %c0_7 = arith.constant 0 : index
    %9 = vector.load %arg11[%c0_6, %c0_7] : memref<64x96xf32, #tpu.memory_space<vmem>>, vector<64x96xf32>
    tpu.vector_store %arg11[%c0_6, %c0_7], %8 {strides = array<i32>} : memref<64x96xf32, #tpu.memory_space<vmem>>, vector<64x96xf32>,
    %c0_8 = arith.constant 0 : index
    %c0_9 = arith.constant 0 : index
    %10 = vector.load %arg3[%c0_8, %c0_9] : memref<32x96xbf16, #tpu.memory_space<vmem>>, vector<32x96xbf16>
    %c0_10 = arith.constant 0 : index
    %c0_11 = arith.constant 0 : index
    %11 = vector.load %arg5[%c0_10, %c0_11] : memref<1x32xf32, #tpu.memory_space<vmem>>, vector<1x32xf32>
    %c0_12 = arith.constant 0 : index
    %c0_13 = arith.constant 0 : index
    %12 = vector.load %arg10[%c0_12, %c0_13] : memref<8x32xf32, #tpu.memory_space<vmem>>, vector<8x32xf32>
    %c0_14 = arith.constant 0 : index
    %c0_15 = arith.constant 0 : index
    %13 = vector.load %arg11[%c0_14, %c0_15] : memref<64x96xf32, #tpu.memory_space<vmem>>, vector<8x96xf32>
    %14 = arith.truncf %12 : vector<8x32xf32> to vector<8x32xbf16>
    %cst_16 = arith.constant dense<0.000000e+00> : vector<8x96xf32>
    %15 = tpu.matmul %14, %10, %cst_16 {dimension_numbers = #tpu.dot_dimension_numbers<[1], [0], [0], [1], [0, 0, 1, 1], [], []>} : vector<8x32xbf16>, vector<32x96xbf16>, vector<8x96xf32> -> vector<8x96xf32>
    %16 = vector.extract_strided_slice %13 {offsets = [0, 0], sizes = [8, 64], strides = [1, 1]} : vector<8x96xf32> to vector<8x64xf32>
    %17 = vector.extract_strided_slice %15 {offsets = [0, 0], sizes = [8, 64], strides = [1, 1]} : vector<8x96xf32> to vector<8x64xf32>
    %18 = arith.addf %16, %17 : vector<8x64xf32>
    %19 = arith.negf %18 : vector<8x64xf32>
    %20 = math.exp %19 : vector<8x64xf32>
    %cst_17 = arith.constant 1.000000e+00 : f32
    %21 = vector.broadcast %cst_17 : f32 to vector<8x64xf32>
    %22 = arith.addf %21, %20 : vector<8x64xf32>
    %23 = arith.divf %21, %22 : vector<8x64xf32>
    %24 = vector.extract_strided_slice %23 {offsets = [0, 0], sizes = [8, 32], strides = [1, 1]} : vector<8x64xf32> to vector<8x32xf32>
    %25 = vector.extract_strided_slice %23 {offsets = [0, 32], sizes = [8, 32], strides = [1, 1]} : vector<8x64xf32> to vector<8x32xf32>
    %26 = vector.extract_strided_slice %13 {offsets = [0, 64], sizes = [8, 32], strides = [1, 1]} : vector<8x96xf32> to vector<8x32xf32>
    %27 = vector.extract_strided_slice %15 {offsets = [0, 64], sizes = [8, 32], strides = [1, 1]} : vector<8x96xf32> to vector<8x32xf32>
    %28 = vector.broadcast %11 : vector<1x32xf32> to vector<8x32xf32>
    %29 = arith.addf %27, %28 : vector<8x32xf32>
    %30 = arith.mulf %24, %29 : vector<8x32xf32>
    %31 = arith.addf %26, %30 : vector<8x32xf32>
    %32 = math.tanh %31 : vector<8x32xf32>
    %33 = arith.subf %12, %32 : vector<8x32xf32>
    %34 = arith.mulf %25, %33 : vector<8x32xf32>
    %35 = arith.addf %32, %34 : vector<8x32xf32>
    %c0_18 = arith.constant 0 : index
    %c0_19 = arith.constant 0 : index
    %36 = vector.load %arg8[%c0_18, %c0_19] : memref<64x32xf32, #tpu.memory_space<vmem>>, vector<8x32xf32>
    tpu.vector_store %arg8[%c0_18, %c0_19], %35 {strides = array<i32>} : memref<64x32xf32, #tpu.memory_space<vmem>>, vector<8x32xf32>,
    %c8 = arith.constant 8 : index
    %c0_20 = arith.constant 0 : index
    %37 = vector.load %arg11[%c8, %c0_20] : memref<64x96xf32, #tpu.memory_space<vmem>>, vector<8x96xf32>
    %38 = arith.truncf %35 : vector<8x32xf32> to vector<8x32xbf16>
    %cst_21 = arith.constant dense<0.000000e+00> : vector<8x96xf32>
    %39 = tpu.matmul %38, %10, %cst_21 {dimension_numbers = #tpu.dot_dimension_numbers<[1], [0], [0], [1], [0, 0, 1, 1], [], []>} : vector<8x32xbf16>, vector<32x96xbf16>, vector<8x96xf32> -> vector<8x96xf32>
    %40 = vector.extract_strided_slice %37 {offsets = [0, 0], sizes = [8, 64], strides = [1, 1]} : vector<8x96xf32> to vector<8x64xf32>
    %41 = vector.extract_strided_slice %39 {offsets = [0, 0], sizes = [8, 64], strides = [1, 1]} : vector<8x96xf32> to vector<8x64xf32>
    %42 = arith.addf %40, %41 : vector<8x64xf32>
    %43 = arith.negf %42 : vector<8x64xf32>
    %44 = math.exp %43 : vector<8x64xf32>
    %cst_22 = arith.constant 1.000000e+00 : f32
    %45 = vector.broadcast %cst_22 : f32 to vector<8x64xf32>
    %46 = arith.addf %45, %44 : vector<8x64xf32>
    %47 = arith.divf %45, %46 : vector<8x64xf32>
    %48 = vector.extract_strided_slice %47 {offsets = [0, 0], sizes = [8, 32], strides = [1, 1]} : vector<8x64xf32> to vector<8x32xf32>
    %49 = vector.extract_strided_slice %47 {offsets = [0, 32], sizes = [8, 32], strides = [1, 1]} : vector<8x64xf32> to vector<8x32xf32>
    %50 = vector.extract_strided_slice %37 {offsets = [0, 64], sizes = [8, 32], strides = [1, 1]} : vector<8x96xf32> to vector<8x32xf32>
    %51 = vector.extract_strided_slice %39 {offsets = [0, 64], sizes = [8, 32], strides = [1, 1]} : vector<8x96xf32> to vector<8x32xf32>
    %52 = vector.broadcast %11 : vector<1x32xf32> to vector<8x32xf32>
    %53 = arith.addf %51, %52 : vector<8x32xf32>
    %54 = arith.mulf %48, %53 : vector<8x32xf32>
    %55 = arith.addf %50, %54 : vector<8x32xf32>
    %56 = math.tanh %55 : vector<8x32xf32>
    %57 = arith.subf %35, %56 : vector<8x32xf32>
    %58 = arith.mulf %49, %57 : vector<8x32xf32>
    %59 = arith.addf %56, %58 : vector<8x32xf32>
    %c8_23 = arith.constant 8 : index
    %c0_24 = arith.constant 0 : index
    %60 = vector.load %arg8[%c8_23, %c0_24] : memref<64x32xf32, #tpu.memory_space<vmem>>, vector<8x32xf32>
    tpu.vector_store %arg8[%c8_23, %c0_24], %59 {strides = array<i32>} : memref<64x32xf32, #tpu.memory_space<vmem>>, vector<8x32xf32>,
    %c16 = arith.constant 16 : index
    %c0_25 = arith.constant 0 : index
    %61 = vector.load %arg11[%c16, %c0_25] : memref<64x96xf32, #tpu.memory_space<vmem>>, vector<8x96xf32>
    %62 = arith.truncf %59 : vector<8x32xf32> to vector<8x32xbf16>
    %cst_26 = arith.constant dense<0.000000e+00> : vector<8x96xf32>
    %63 = tpu.matmul %62, %10, %cst_26 {dimension_numbers = #tpu.dot_dimension_numbers<[1], [0], [0], [1], [0, 0, 1, 1], [], []>} : vector<8x32xbf16>, vector<32x96xbf16>, vector<8x96xf32> -> vector<8x96xf32>
    %64 = vector.extract_strided_slice %61 {offsets = [0, 0], sizes = [8, 64], strides = [1, 1]} : vector<8x96xf32> to vector<8x64xf32>
    %65 = vector.extract_strided_slice %63 {offsets = [0, 0], sizes = [8, 64], strides = [1, 1]} : vector<8x96xf32> to vector<8x64xf32>
    %66 = arith.addf %64, %65 : vector<8x64xf32>
    %67 = arith.negf %66 : vector<8x64xf32>
    %68 = math.exp %67 : vector<8x64xf32>
    %cst_27 = arith.constant 1.000000e+00 : f32
    %69 = vector.broadcast %cst_27 : f32 to vector<8x64xf32>
    %70 = arith.addf %69, %68 : vector<8x64xf32>
    %71 = arith.divf %69, %70 : vector<8x64xf32>
    %72 = vector.extract_strided_slice %71 {offsets = [0, 0], sizes = [8, 32], strides = [1, 1]} : vector<8x64xf32> to vector<8x32xf32>
    %73 = vector.extract_strided_slice %71 {offsets = [0, 32], sizes = [8, 32], strides = [1, 1]} : vector<8x64xf32> to vector<8x32xf32>
    %74 = vector.extract_strided_slice %61 {offsets = [0, 64], sizes = [8, 32], strides = [1, 1]} : vector<8x96xf32> to vector<8x32xf32>
    %75 = vector.extract_strided_slice %63 {offsets = [0, 64], sizes = [8, 32], strides = [1, 1]} : vector<8x96xf32> to vector<8x32xf32>
    %76 = vector.broadcast %11 : vector<1x32xf32> to vector<8x32xf32>
    %77 = arith.addf %75, %76 : vector<8x32xf32>
    %78 = arith.mulf %72, %77 : vector<8x32xf32>
    %79 = arith.addf %74, %78 : vector<8x32xf32>
    %80 = math.tanh %79 : vector<8x32xf32>
    %81 = arith.subf %59, %80 : vector<8x32xf32>
    %82 = arith.mulf %73, %81 : vector<8x32xf32>
    %83 = arith.addf %80, %82 : vector<8x32xf32>
    %c16_28 = arith.constant 16 : index
    %c0_29 = arith.constant 0 : index
    %84 = vector.load %arg8[%c16_28, %c0_29] : memref<64x32xf32, #tpu.memory_space<vmem>>, vector<8x32xf32>
    tpu.vector_store %arg8[%c16_28, %c0_29], %83 {strides = array<i32>} : memref<64x32xf32, #tpu.memory_space<vmem>>, vector<8x32xf32>,
    %c24 = arith.constant 24 : index
    %c0_30 = arith.constant 0 : index
    %85 = vector.load %arg11[%c24, %c0_30] : memref<64x96xf32, #tpu.memory_space<vmem>>, vector<8x96xf32>
    %86 = arith.truncf %83 : vector<8x32xf32> to vector<8x32xbf16>
    %cst_31 = arith.constant dense<0.000000e+00> : vector<8x96xf32>
    %87 = tpu.matmul %86, %10, %cst_31 {dimension_numbers = #tpu.dot_dimension_numbers<[1], [0], [0], [1], [0, 0, 1, 1], [], []>} : vector<8x32xbf16>, vector<32x96xbf16>, vector<8x96xf32> -> vector<8x96xf32>
    %88 = vector.extract_strided_slice %85 {offsets = [0, 0], sizes = [8, 64], strides = [1, 1]} : vector<8x96xf32> to vector<8x64xf32>
    %89 = vector.extract_strided_slice %87 {offsets = [0, 0], sizes = [8, 64], strides = [1, 1]} : vector<8x96xf32> to vector<8x64xf32>
    %90 = arith.addf %88, %89 : vector<8x64xf32>
    %91 = arith.negf %90 : vector<8x64xf32>
    %92 = math.exp %91 : vector<8x64xf32>
    %cst_32 = arith.constant 1.000000e+00 : f32
    %93 = vector.broadcast %cst_32 : f32 to vector<8x64xf32>
    %94 = arith.addf %93, %92 : vector<8x64xf32>
    %95 = arith.divf %93, %94 : vector<8x64xf32>
    %96 = vector.extract_strided_slice %95 {offsets = [0, 0], sizes = [8, 32], strides = [1, 1]} : vector<8x64xf32> to vector<8x32xf32>
    %97 = vector.extract_strided_slice %95 {offsets = [0, 32], sizes = [8, 32], strides = [1, 1]} : vector<8x64xf32> to vector<8x32xf32>
    %98 = vector.extract_strided_slice %85 {offsets = [0, 64], sizes = [8, 32], strides = [1, 1]} : vector<8x96xf32> to vector<8x32xf32>
    %99 = vector.extract_strided_slice %87 {offsets = [0, 64], sizes = [8, 32], strides = [1, 1]} : vector<8x96xf32> to vector<8x32xf32>
    %100 = vector.broadcast %11 : vector<1x32xf32> to vector<8x32xf32>
    %101 = arith.addf %99, %100 : vector<8x32xf32>
    %102 = arith.mulf %96, %101 : vector<8x32xf32>
    %103 = arith.addf %98, %102 : vector<8x32xf32>
    %104 = math.tanh %103 : vector<8x32xf32>
    %105 = arith.subf %83, %104 : vector<8x32xf32>
    %106 = arith.mulf %97, %105 : vector<8x32xf32>
    %107 = arith.addf %104, %106 : vector<8x32xf32>
    %c24_33 = arith.constant 24 : index
    %c0_34 = arith.constant 0 : index
    %108 = vector.load %arg8[%c24_33, %c0_34] : memref<64x32xf32, #tpu.memory_space<vmem>>, vector<8x32xf32>
    tpu.vector_store %arg8[%c24_33, %c0_34], %107 {strides = array<i32>} : memref<64x32xf32, #tpu.memory_space<vmem>>, vector<8x32xf32>,
    %c32 = arith.constant 32 : index
    %c0_35 = arith.constant 0 : index
    %109 = vector.load %arg11[%c32, %c0_35] : memref<64x96xf32, #tpu.memory_space<vmem>>, vector<8x96xf32>
    %110 = arith.truncf %107 : vector<8x32xf32> to vector<8x32xbf16>
    %cst_36 = arith.constant dense<0.000000e+00> : vector<8x96xf32>
    %111 = tpu.matmul %110, %10, %cst_36 {dimension_numbers = #tpu.dot_dimension_numbers<[1], [0], [0], [1], [0, 0, 1, 1], [], []>} : vector<8x32xbf16>, vector<32x96xbf16>, vector<8x96xf32> -> vector<8x96xf32>
    %112 = vector.extract_strided_slice %109 {offsets = [0, 0], sizes = [8, 64], strides = [1, 1]} : vector<8x96xf32> to vector<8x64xf32>
    %113 = vector.extract_strided_slice %111 {offsets = [0, 0], sizes = [8, 64], strides = [1, 1]} : vector<8x96xf32> to vector<8x64xf32>
    %114 = arith.addf %112, %113 : vector<8x64xf32>
    %115 = arith.negf %114 : vector<8x64xf32>
    %116 = math.exp %115 : vector<8x64xf32>
    %cst_37 = arith.constant 1.000000e+00 : f32
    %117 = vector.broadcast %cst_37 : f32 to vector<8x64xf32>
    %118 = arith.addf %117, %116 : vector<8x64xf32>
    %119 = arith.divf %117, %118 : vector<8x64xf32>
    %120 = vector.extract_strided_slice %119 {offsets = [0, 0], sizes = [8, 32], strides = [1, 1]} : vector<8x64xf32> to vector<8x32xf32>
    %121 = vector.extract_strided_slice %119 {offsets = [0, 32], sizes = [8, 32], strides = [1, 1]} : vector<8x64xf32> to vector<8x32xf32>
    %122 = vector.extract_strided_slice %109 {offsets = [0, 64], sizes = [8, 32], strides = [1, 1]} : vector<8x96xf32> to vector<8x32xf32>
    %123 = vector.extract_strided_slice %111 {offsets = [0, 64], sizes = [8, 32], strides = [1, 1]} : vector<8x96xf32> to vector<8x32xf32>
    %124 = vector.broadcast %11 : vector<1x32xf32> to vector<8x32xf32>
    %125 = arith.addf %123, %124 : vector<8x32xf32>
    %126 = arith.mulf %120, %125 : vector<8x32xf32>
    %127 = arith.addf %122, %126 : vector<8x32xf32>
    %128 = math.tanh %127 : vector<8x32xf32>
    %129 = arith.subf %107, %128 : vector<8x32xf32>
    %130 = arith.mulf %121, %129 : vector<8x32xf32>
    %131 = arith.addf %128, %130 : vector<8x32xf32>
    %c32_38 = arith.constant 32 : index
    %c0_39 = arith.constant 0 : index
    %132 = vector.load %arg8[%c32_38, %c0_39] : memref<64x32xf32, #tpu.memory_space<vmem>>, vector<8x32xf32>
    tpu.vector_store %arg8[%c32_38, %c0_39], %131 {strides = array<i32>} : memref<64x32xf32, #tpu.memory_space<vmem>>, vector<8x32xf32>,
    %c40 = arith.constant 40 : index
    %c0_40 = arith.constant 0 : index
    %133 = vector.load %arg11[%c40, %c0_40] : memref<64x96xf32, #tpu.memory_space<vmem>>, vector<8x96xf32>
    %134 = arith.truncf %131 : vector<8x32xf32> to vector<8x32xbf16>
    %cst_41 = arith.constant dense<0.000000e+00> : vector<8x96xf32>
    %135 = tpu.matmul %134, %10, %cst_41 {dimension_numbers = #tpu.dot_dimension_numbers<[1], [0], [0], [1], [0, 0, 1, 1], [], []>} : vector<8x32xbf16>, vector<32x96xbf16>, vector<8x96xf32> -> vector<8x96xf32>
    %136 = vector.extract_strided_slice %133 {offsets = [0, 0], sizes = [8, 64], strides = [1, 1]} : vector<8x96xf32> to vector<8x64xf32>
    %137 = vector.extract_strided_slice %135 {offsets = [0, 0], sizes = [8, 64], strides = [1, 1]} : vector<8x96xf32> to vector<8x64xf32>
    %138 = arith.addf %136, %137 : vector<8x64xf32>
    %139 = arith.negf %138 : vector<8x64xf32>
    %140 = math.exp %139 : vector<8x64xf32>
    %cst_42 = arith.constant 1.000000e+00 : f32
    %141 = vector.broadcast %cst_42 : f32 to vector<8x64xf32>
    %142 = arith.addf %141, %140 : vector<8x64xf32>
    %143 = arith.divf %141, %142 : vector<8x64xf32>
    %144 = vector.extract_strided_slice %143 {offsets = [0, 0], sizes = [8, 32], strides = [1, 1]} : vector<8x64xf32> to vector<8x32xf32>
    %145 = vector.extract_strided_slice %143 {offsets = [0, 32], sizes = [8, 32], strides = [1, 1]} : vector<8x64xf32> to vector<8x32xf32>
    %146 = vector.extract_strided_slice %133 {offsets = [0, 64], sizes = [8, 32], strides = [1, 1]} : vector<8x96xf32> to vector<8x32xf32>
    %147 = vector.extract_strided_slice %135 {offsets = [0, 64], sizes = [8, 32], strides = [1, 1]} : vector<8x96xf32> to vector<8x32xf32>
    %148 = vector.broadcast %11 : vector<1x32xf32> to vector<8x32xf32>
    %149 = arith.addf %147, %148 : vector<8x32xf32>
    %150 = arith.mulf %144, %149 : vector<8x32xf32>
    %151 = arith.addf %146, %150 : vector<8x32xf32>
    %152 = math.tanh %151 : vector<8x32xf32>
    %153 = arith.subf %131, %152 : vector<8x32xf32>
    %154 = arith.mulf %145, %153 : vector<8x32xf32>
    %155 = arith.addf %152, %154 : vector<8x32xf32>
    %c40_43 = arith.constant 40 : index
    %c0_44 = arith.constant 0 : index
    %156 = vector.load %arg8[%c40_43, %c0_44] : memref<64x32xf32, #tpu.memory_space<vmem>>, vector<8x32xf32>
    tpu.vector_store %arg8[%c40_43, %c0_44], %155 {strides = array<i32>} : memref<64x32xf32, #tpu.memory_space<vmem>>, vector<8x32xf32>,
    %c48 = arith.constant 48 : index
    %c0_45 = arith.constant 0 : index
    %157 = vector.load %arg11[%c48, %c0_45] : memref<64x96xf32, #tpu.memory_space<vmem>>, vector<8x96xf32>
    %158 = arith.truncf %155 : vector<8x32xf32> to vector<8x32xbf16>
    %cst_46 = arith.constant dense<0.000000e+00> : vector<8x96xf32>
    %159 = tpu.matmul %158, %10, %cst_46 {dimension_numbers = #tpu.dot_dimension_numbers<[1], [0], [0], [1], [0, 0, 1, 1], [], []>} : vector<8x32xbf16>, vector<32x96xbf16>, vector<8x96xf32> -> vector<8x96xf32>
    %160 = vector.extract_strided_slice %157 {offsets = [0, 0], sizes = [8, 64], strides = [1, 1]} : vector<8x96xf32> to vector<8x64xf32>
    %161 = vector.extract_strided_slice %159 {offsets = [0, 0], sizes = [8, 64], strides = [1, 1]} : vector<8x96xf32> to vector<8x64xf32>
    %162 = arith.addf %160, %161 : vector<8x64xf32>
    %163 = arith.negf %162 : vector<8x64xf32>
    %164 = math.exp %163 : vector<8x64xf32>
    %cst_47 = arith.constant 1.000000e+00 : f32
    %165 = vector.broadcast %cst_47 : f32 to vector<8x64xf32>
    %166 = arith.addf %165, %164 : vector<8x64xf32>
    %167 = arith.divf %165, %166 : vector<8x64xf32>
    %168 = vector.extract_strided_slice %167 {offsets = [0, 0], sizes = [8, 32], strides = [1, 1]} : vector<8x64xf32> to vector<8x32xf32>
    %169 = vector.extract_strided_slice %167 {offsets = [0, 32], sizes = [8, 32], strides = [1, 1]} : vector<8x64xf32> to vector<8x32xf32>
    %170 = vector.extract_strided_slice %157 {offsets = [0, 64], sizes = [8, 32], strides = [1, 1]} : vector<8x96xf32> to vector<8x32xf32>
    %171 = vector.extract_strided_slice %159 {offsets = [0, 64], sizes = [8, 32], strides = [1, 1]} : vector<8x96xf32> to vector<8x32xf32>
    %172 = vector.broadcast %11 : vector<1x32xf32> to vector<8x32xf32>
    %173 = arith.addf %171, %172 : vector<8x32xf32>
    %174 = arith.mulf %168, %173 : vector<8x32xf32>
    %175 = arith.addf %170, %174 : vector<8x32xf32>
    %176 = math.tanh %175 : vector<8x32xf32>
    %177 = arith.subf %155, %176 : vector<8x32xf32>
    %178 = arith.mulf %169, %177 : vector<8x32xf32>
    %179 = arith.addf %176, %178 : vector<8x32xf32>
    %c48_48 = arith.constant 48 : index
    %c0_49 = arith.constant 0 : index
    %180 = vector.load %arg8[%c48_48, %c0_49] : memref<64x32xf32, #tpu.memory_space<vmem>>, vector<8x32xf32>
    tpu.vector_store %arg8[%c48_48, %c0_49], %179 {strides = array<i32>} : memref<64x32xf32, #tpu.memory_space<vmem>>, vector<8x32xf32>,
    %c56 = arith.constant 56 : index
    %c0_50 = arith.constant 0 : index
    %181 = vector.load %arg11[%c56, %c0_50] : memref<64x96xf32, #tpu.memory_space<vmem>>, vector<8x96xf32>
    %182 = arith.truncf %179 : vector<8x32xf32> to vector<8x32xbf16>
    %cst_51 = arith.constant dense<0.000000e+00> : vector<8x96xf32>
    %183 = tpu.matmul %182, %10, %cst_51 {dimension_numbers = #tpu.dot_dimension_numbers<[1], [0], [0], [1], [0, 0, 1, 1], [], []>} : vector<8x32xbf16>, vector<32x96xbf16>, vector<8x96xf32> -> vector<8x96xf32>
    %184 = vector.extract_strided_slice %181 {offsets = [0, 0], sizes = [8, 64], strides = [1, 1]} : vector<8x96xf32> to vector<8x64xf32>
    %185 = vector.extract_strided_slice %183 {offsets = [0, 0], sizes = [8, 64], strides = [1, 1]} : vector<8x96xf32> to vector<8x64xf32>
    %186 = arith.addf %184, %185 : vector<8x64xf32>
    %187 = arith.negf %186 : vector<8x64xf32>
    %188 = math.exp %187 : vector<8x64xf32>
    %cst_52 = arith.constant 1.000000e+00 : f32
    %189 = vector.broadcast %cst_52 : f32 to vector<8x64xf32>
    %190 = arith.addf %189, %188 : vector<8x64xf32>
    %191 = arith.divf %189, %190 : vector<8x64xf32>
    %192 = vector.extract_strided_slice %191 {offsets = [0, 0], sizes = [8, 32], strides = [1, 1]} : vector<8x64xf32> to vector<8x32xf32>
    %193 = vector.extract_strided_slice %191 {offsets = [0, 32], sizes = [8, 32], strides = [1, 1]} : vector<8x64xf32> to vector<8x32xf32>
    %194 = vector.extract_strided_slice %181 {offsets = [0, 64], sizes = [8, 32], strides = [1, 1]} : vector<8x96xf32> to vector<8x32xf32>
    %195 = vector.extract_strided_slice %183 {offsets = [0, 64], sizes = [8, 32], strides = [1, 1]} : vector<8x96xf32> to vector<8x32xf32>
    %196 = vector.broadcast %11 : vector<1x32xf32> to vector<8x32xf32>
    %197 = arith.addf %195, %196 : vector<8x32xf32>
    %198 = arith.mulf %192, %197 : vector<8x32xf32>
    %199 = arith.addf %194, %198 : vector<8x32xf32>
    %200 = math.tanh %199 : vector<8x32xf32>
    %201 = arith.subf %179, %200 : vector<8x32xf32>
    %202 = arith.mulf %193, %201 : vector<8x32xf32>
    %203 = arith.addf %200, %202 : vector<8x32xf32>
    %c56_53 = arith.constant 56 : index
    %c0_54 = arith.constant 0 : index
    %204 = vector.load %arg8[%c56_53, %c0_54] : memref<64x32xf32, #tpu.memory_space<vmem>>, vector<8x32xf32>
    tpu.vector_store %arg8[%c56_53, %c0_54], %203 {strides = array<i32>} : memref<64x32xf32, #tpu.memory_space<vmem>>, vector<8x32xf32>,
    %c0_55 = arith.constant 0 : index
    %c0_56 = arith.constant 0 : index
    %205 = vector.load %arg10[%c0_55, %c0_56] : memref<8x32xf32, #tpu.memory_space<vmem>>, vector<8x32xf32>
    tpu.vector_store %arg10[%c0_55, %c0_56], %203 {strides = array<i32>} : memref<8x32xf32, #tpu.memory_space<vmem>>, vector<8x32xf32>,
    %c0_57 = arith.constant 0 : index
    %c0_58 = arith.constant 0 : index
    %206 = vector.load %arg8[%c0_57, %c0_58] : memref<64x32xf32, #tpu.memory_space<vmem>>, vector<64x32xf32>
    %c0_59 = arith.constant 0 : index
    %c0_60 = arith.constant 0 : index
    %207 = vector.load %arg6[%c0_59, %c0_60] : memref<1x32xf32, #tpu.memory_space<vmem>>, vector<1x32xf32>
    %208 = vector.broadcast %207 : vector<1x32xf32> to vector<64x32xf32>
    %209 = arith.mulf %206, %208 : vector<64x32xf32>
    %c0_61 = arith.constant 0 : index
    %c0_62 = arith.constant 0 : index
    %210 = vector.load %arg8[%c0_61, %c0_62] : memref<64x32xf32, #tpu.memory_space<vmem>>, vector<64x32xf32>
    tpu.vector_store %arg8[%c0_61, %c0_62], %209 {strides = array<i32>} : memref<64x32xf32, #tpu.memory_space<vmem>>, vector<64x32xf32>,
    %c0_i32_63 = arith.constant 0 : i32
    %211 = arith.cmpi eq, %arg0, %c0_i32_63 : i32
    %212 = arith.extui %211 : i1 to i32
    %c0_i32_64 = arith.constant 0 : i32
    %213 = arith.cmpi ne, %212, %c0_i32_64 : i32
    scf.if %213 {
      %c0_65 = arith.constant 0 : index
      %c0_66 = arith.constant 0 : index
      %214 = vector.load %arg7[%c0_65, %c0_66] : memref<1x32xf32, #tpu.memory_space<vmem>>, vector<1x32xf32>
      %215 = vector.broadcast %214 : vector<1x32xf32> to vector<8x32xf32>
      %216 = arith.mulf %215, %203 : vector<8x32xf32>
      %c0_67 = arith.constant 0 : index
      %c0_68 = arith.constant 0 : index
      %217 = vector.load %arg9[%c0_67, %c0_68] : memref<8x32xf32, #tpu.memory_space<vmem>>, vector<8x32xf32>
      tpu.vector_store %arg9[%c0_67, %c0_68], %216 {strides = array<i32>} : memref<8x32xf32, #tpu.memory_space<vmem>>, vector<8x32xf32>,
    } else {
    }
    return
  }
  func.func @transform_0(%arg0: i32) -> (i32, i32) {
    %c0_i32 = arith.constant 0 : i32
    %c0_i32_0 = arith.constant 0 : i32
    return %arg0, %c0_i32 : i32, i32
  }
  func.func @transform_1(%arg0: i32) -> (i32, i32) {
    %c0_i32 = arith.constant 0 : i32
    %c0_i32_0 = arith.constant 0 : i32
    %c0_i32_1 = arith.constant 0 : i32
    return %c0_i32, %c0_i32_0 : i32, i32
  }
  func.func @transform_2(%arg0: i32) -> (i32, i32) {
    %c0_i32 = arith.constant 0 : i32
    %c0_i32_0 = arith.constant 0 : i32
    %c0_i32_1 = arith.constant 0 : i32
    return %c0_i32, %c0_i32_0 : i32, i32
  }
  func.func @transform_3(%arg0: i32) -> (i32, i32) {
    %c0_i32 = arith.constant 0 : i32
    %c0_i32_0 = arith.constant 0 : i32
    %c0_i32_1 = arith.constant 0 : i32
    return %c0_i32, %c0_i32_0 : i32, i32
  }
  func.func @transform_4(%arg0: i32) -> (i32, i32) {
    %c0_i32 = arith.constant 0 : i32
    %c0_i32_0 = arith.constant 0 : i32
    %c0_i32_1 = arith.constant 0 : i32
    return %c0_i32, %c0_i32_0 : i32, i32
  }
  func.func @transform_5(%arg0: i32) -> (i32, i32) {
    %c0_i32 = arith.constant 0 : i32
    %c0_i32_0 = arith.constant 0 : i32
    %c0_i32_1 = arith.constant 0 : i32
    return %c0_i32, %c0_i32_0 : i32, i32
  }
  func.func @transform_6(%arg0: i32) -> (i32, i32) {
    %c0_i32 = arith.constant 0 : i32
    %c0_i32_0 = arith.constant 0 : i32
    %c0_i32_1 = arith.constant 0 : i32
    return %c0_i32, %c0_i32_0 : i32, i32
  }
  func.func @transform_7(%arg0: i32) -> (i32, i32) {
    %c0_i32 = arith.constant 0 : i32
    %c0_i32_0 = arith.constant 0 : i32
    return %arg0, %c0_i32 : i32, i32
  }
  func.func @transform_8(%arg0: i32) -> (i32, i32) {
    %c0_i32 = arith.constant 0 : i32
    %c0_i32_0 = arith.constant 0 : i32
    %c0_i32_1 = arith.constant 0 : i32
    return %c0_i32, %c0_i32_0 : i32, i32
  }
}

</mosaic_0001>

<bundles_post_ra>
// kernel: tpu_custom_call.1
= control target key start
LH: loop header
LB: loop body
LE: loop exit
PB: predicated region body
PF: predicated region fallthrough
CT: control target
= control target key end

     0   :  { %v1139_v1 = vmov 0.0   ;;  %vm79_vm0 = vcmask 130048   ;;  %vm34_vm1 = vcmask 261120   ;;  %vm1140_vm2 = vmmov 0   ;;  %s1141_s16 = smov 64   ;;  %s1504_s0 = inlined_call_operand.vmem [shape: bf16[64,16], index: 0, kind: input, shape index: {}]   ;;  %s1505_s1 = inlined_call_operand.vmem [shape: bf16[16,96], index: 1, kind: input, shape index: {}]   ;;  %s1506_s2 = inlined_call_operand.vmem [shape: bf16[32,96], index: 2, kind: input, shape index: {}]   ;;  %s1507_s3 = inlined_call_operand.vmem [shape: f32[1,96], index: 3, kind: input, shape index: {}]   ;;  %s1508_s4 = inlined_call_operand.vmem [shape: f32[1,32], index: 4, kind: input, shape index: {}]   ;;  %s1509_s5 = inlined_call_operand.vmem [shape: f32[1,32], index: 5, kind: input, shape index: {}]   ;;  %s1510_s6 = inlined_call_operand.vmem [shape: f32[1,32], index: 6, kind: input, shape index: {}]   ;;  %s1511_s7 = inlined_call_operand.vmem [shape: f32[64,32], index: 7, kind: output, shape index: {0}]   ;;  %s1512_s8 = inlined_call_operand.hbm [shape: f32[8,32], index: 8, kind: output, shape index: {1}]  }
   0x1   :  { %v1060_v0 = vld [vmem:[%s1505_s1] sm:$0xff]   ;;  %990 = vmatprep.subr.bf16.mxu1 %v1139_v1  ;;  %v1063_v4 = vld [vmem:[%s1504_s0 + $0x8] sm:$0xff]   ;;  %35 = vst.msk [vmem:[#allocation2] sm:$0xff] %vm34_vm1, %v1139_v1  ;;  %994 = vmatprep.mubr.msk.bf16.mxu1 %vm1140_vm2, %v1139_v1 }
   0x2   :  { %v1197_v2 = vld [vmem:[%s1506_s2] sm:$0xff]   ;;  %980 = vmatprep.subr.bf16.mxu0 %v1060_v0  ;;  %v1211_v5 = vld [vmem:[%s1506_s2 + $0x8] sm:$0xff]  }
   0x3   :  { %v1062_v3 = vld [vmem:[%s1504_s0] sm:$0xff]   ;;  %981 = vmatpush3.bf16.msra.mxu0 %v1060_v0  ;;  %991 = vmatpush3.bf16.msra.mxu1 %v1197_v2 }
   0x4   :  { %982 = vmatprep.mubr.msk.bf16.mxu0 %vm79_vm0, %v1062_v3  ;;  %992 = vmatprep.subr.bf16.mxu1 %v1139_v1  ;;  %v934_v6 = vld [vmem:[%s1508_s4] ss:$0 sm:$0xff] }
   0x5   :  { %1006 = vmatprep.subr.bf16.mxu0 %v1139_v1  ;;  %242 = vrot.lane.b32.xlu0 %v934_v6, %s1141_s16 }
   0x6   :  { %983 = vmatmul.mubr.msk.bf16.vlgmr.msra.gmra.mrb[0].mxu0 %vm79_vm0, %v1063_v4 }
   0x7   :  { %14 = vsyncpa [#allocation5], 0  ;;  %993 = vmatpush3.bf16.msra.mxu1 %v1211_v5  ;;  %1007 = vmatpush3.bf16.msra.mxu0 %v1197_v2  ;;  %v1239_v9 = vld [vmem:[%s1507_s3] ss:$0 sm:$0xff]  ;;  %vm157_vm3 = vcmask 785408   ;;  %s1142_s3 = smov 32  }
   0x8   :  { %998 = vmatprep.subr.bf16.mxu1 %v1139_v1  ;;  %1008 = vmatprep.subr.bf16.mxu0 %v1139_v1  ;;  %v171_v7 = vld [vmem:[#allocation2] sm:$0xff]  ;;  %s1143_s17 = smov 96   ;;  %v1065_v60 = vld [vmem:[%s1504_s0 + $0x10] sm:$0xff]   ;;  %v1066_v61 = vld [vmem:[%s1504_s0 + $0x18] sm:$0xff]   ;;  %s1144_s15 = smov [#allocation4]  }
   0x9   :  { %v173_v8 = vpack.c.bf16 %v171_v7, %v171_v7  ;;  %986 = vmatprep.mubr.msk.bf16.mxu0 %vm79_vm0, %v1065_v60  ;;  %s910_s2 = sshll.u32 %s1144_s15, 4  ;;  %s911_s2 = int_to_ptr.vmem [resolvable:$true] %s910_s2 }
   0xa   :  { %p1120_p1 = scmp.lt.s32.totalorder %s911_s2, %s911_s2 }
   0xb   :  { %1009 = vmatpush3.bf16.msra.mxu0 %v1211_v5  ;;  %995 = vmatmul.mubr.msk.bf16.vlgmr.msra.gmra.mrb[0].mxu1 %vm34_vm1, %v173_v8 }
   0xc   :  { %1022 = vmatprep.subr.bf16.mxu0 %v1139_v1  ;;  %999 = vmatpush3.bf16.msra.mxu1 %v1197_v2 }
   0xd   :  { %1002 = vmatprep.mubr.msk.bf16.mxu1 %vm1140_vm2, %v1139_v1  ;;  %1000 = vmatprep.subr.bf16.mxu1 %v1139_v1 }
   0xe   :  { %987 = vmatmul.mubr.msk.bf16.gmra.mrb[4].mxu0 %vm79_vm0, %v1066_v61 }
   0xf   :  { %1010 = vmatprep.mubr.msk.bf16.mxu0 %vm1140_vm2, %v1139_v1 }
  0x10   :  { %1001 = vmatpush3.bf16.msra.mxu1 %v1211_v5 }
  0x11   :  { %1014 = vmatprep.subr.bf16.mxu1 %v1139_v1 }
  0x77   :  { %v1248_v18 = vpop.permute.xlu0 %242 }
  0xd9   :  { %v984_v10 = vpop.f32.mrb[0].mxu0 }
  0xda   :  { %v135_v11 = vadd.f32 %v984_v10, %v1239_v9  ;;  %v126_v12 = vpop.f32.mrb[1].mxu0 }
  0xdb   :  { %v127_v13 = vadd.f32 %v1239_v9, %v126_v12  ;;  %v985_v14 = vpop.f32.mrb[2].mxu0 }
  0xdc   :  { %160 = vst.msk [vmem:[#allocation3 + $0x10] sm:$0xff] %vm157_vm3, %v135_v11  ;;  %v138_v15 = vadd.f32 %v985_v14, %v1239_v9  ;;  %v129_v16 = vpop.f32.mrb[3].mxu0 }
  0xdd   :  { %158 = vst.msk [vmem:[#allocation3] sm:$0xff] %vm157_vm3, %v127_v13  ;;  %v130_v17 = vadd.f32 %v1239_v9, %v129_v16 }
  0xde   :  { %161 = vst.msk [vmem:[#allocation3 + $0x18] sm:$0xff] %vm157_vm3, %v138_v15  ;;  %v224_v19 = vpop.f32.mrb[0].mxu1 }
  0xdf   :  { %159 = vst.msk [vmem:[#allocation3 + $0x8] sm:$0xff] %vm157_vm3, %v130_v17  ;;  %v245_v20 = vadd.f32 %v1248_v18, %v224_v19  ;;  %v996_v21 = vpop.f32.mrb[1].mxu1 }
  0xe0   :  { %v227_v22 = vpop.f32.mrb[2].mxu1 }
  0xe1   :  { %247 = vrot.lane.b32.xlu0 %v245_v20, %s1141_s16  ;;  %v997_v23 = vpop.f32.mrb[3].mxu1  ;;  %v988_v6 = vpop.f32.mrb[4].mxu0 }
  0xe2   :  { %v142_v8 = vpop.f32.mrb[5].mxu0 }
  0xe3   :  { %v143_v10 = vadd.f32 %v1239_v9, %v142_v8  ;;  %v989_v11 = vpop.f32.mrb[6].mxu0  ;;  %v360_v21 = vld [vmem:[#allocation3 + $0x10] sm:$0xff] }
  0xe4   :  { %v172_v24 = vld [vmem:[#allocation3] sm:$0xff]  ;;  %v154_v12 = vadd.f32 %v989_v11, %v1239_v9  ;;  %v145_v13 = vpop.f32.mrb[7].mxu0 }
  0xe5   :  { %v230_v25 = vadd.f32 %v224_v19, %v172_v24  ;;  %162 = vst.msk [vmem:[#allocation3 + $0x20] sm:$0xff] %vm157_vm3, %v143_v10  ;;  %v146_v14 = vadd.f32 %v1239_v9, %v145_v13 }
  0xe6   :  { %v277_v48 = vld [vmem:[#allocation3 + $0x8] sm:$0xff]  ;;  %165 = vst.msk [vmem:[#allocation3 + $0x38] sm:$0xff] %vm157_vm3, %v154_v12 }
  0xe7   :  { %v933_v26 = vmul.f32 -1.442695, %v230_v25  ;;  %163 = vst.msk [vmem:[#allocation3 + $0x28] sm:$0xff] %vm157_vm3, %v146_v14 }
  0xe9   :  { %1067 = vpow2.f32 %v933_v26 }
  0xec   :  { %v526_v8 = vld [vmem:[#allocation3 + $0x20] sm:$0xff] }
  0xf3   :  { %v1068_v27 = vpop.eup %1067 }
  0xf4   :  { %v234_v28 = vadd.f32 1.0, %v1068_v27 }
  0xf6   :  { %1069 = vrcp.f32 %v234_v28 }
 0x100   :  { %v1070_v29 = vpop.eup %1069 }
 0x153   :  { %v248_v30 = vpop.permute.xlu0 %247 }
 0x154   :  { %v250_v31 = vmul.f32 %v1070_v29, %v248_v30 }
 0x156   :  { %252 = vrot.lane.b32.xlu1 %v250_v31, %s1141_s16 }
 0x1c8   :  { %v253_v32 = vpop.permute.xlu1 %252 }
 0x1c9   :  { %v255_v33 = vadd.f32 %v253_v32, %v172_v24 }
 0x1cb   :  { %1071 = vtanh.f32 %v255_v33 }
 0x1d5   :  { %v1072_v34 = vpop.eup %1071 }
 0x1d6   :  { %258 = vrot.lane.b32.xlu1 %v1072_v34, %s1141_s16 }
 0x248   :  { %v259_v35 = vpop.permute.xlu1 %258 }
 0x249   :  { %v261_v36 = vsub.f32 %v171_v7, %v259_v35  ;;  %v151_v7 = vadd.f32 %v988_v6, %v1239_v9 }
 0x24b   :  { %263 = vrot.lane.b32.xlu0 %v261_v36, %s1142_s3  ;;  %164 = vst.msk [vmem:[#allocation3 + $0x30] sm:$0xff] %vm157_vm3, %v151_v7 }
 0x2bd   :  { %v264_v37 = vpop.permute.xlu0 %263 }
 0x2be   :  { %v266_v38 = vmul.f32 %v1070_v29, %v264_v37 }
 0x2c0   :  { %268 = vrot.lane.b32.xlu1 %v266_v38, %s1142_s3 }
 0x332   :  { %v269_v39 = vpop.permute.xlu1 %268 }
 0x333   :  { %v1257_v40 = vadd.f32 %v1072_v34, %v269_v39 }
 0x335   :  { %v278_v41 = vpack.c.bf16 %v1257_v40, %v1257_v40 }
 0x337   :  { %280 = vrot.lane.b32.xlu0 %v278_v41, %s1141_s16 }
 0x3a9   :  { %v281_v42 = vpop.permute.xlu0 %280 }
 0x3aa   :  { %1003 = vmatmul.mubr.msk.bf16.vlgmr.msra.gmra.mrb[4].mxu1 %vm34_vm1, %v281_v42 }
 0x3ab   :  { %1015 = vmatpush3.bf16.msra.mxu1 %v1197_v2  ;;  %1018 = vmatprep.mubr.msk.bf16.mxu1 %vm1140_vm2, %v1139_v1 }
 0x3ac   :  { %1016 = vmatprep.subr.bf16.mxu1 %v1139_v1 }
 0x3af   :  { %1017 = vmatpush3.bf16.msra.mxu1 %v1211_v5 }
 0x3b0   :  { %1030 = vmatprep.subr.bf16.mxu1 %v1139_v1 }
 0x47d   :  { %v319_v43 = vpop.f32.mrb[4].mxu1 }
 0x47e   :  { %v332_v44 = vadd.f32 %v319_v43, %v1248_v18  ;;  %v1004_v45 = vpop.f32.mrb[5].mxu1  ;;  %v325_v49 = vadd.f32 %v319_v43, %v277_v48 }
 0x47f   :  { %v322_v46 = vpop.f32.mrb[6].mxu1  ;;  %v443_v45 = vld [vmem:[#allocation3 + $0x18] sm:$0xff] }
 0x480   :  { %334 = vrot.lane.b32.xlu1 %v332_v44, %s1141_s16  ;;  %v1005_v47 = vpop.f32.mrb[7].mxu1  ;;  %v936_v50 = vmul.f32 -1.442695, %v325_v49 }
 0x482   :  { %1073 = vpow2.f32 %v936_v50 }
 0x48c   :  { %v1074_v51 = vpop.eup %1073 }
 0x48d   :  { %v329_v52 = vadd.f32 1.0, %v1074_v51 }
 0x48f   :  { %1075 = vrcp.f32 %v329_v52 }
 0x499   :  { %v1076_v53 = vpop.eup %1075 }
 0x4f2   :  { %v335_v54 = vpop.permute.xlu1 %334 }
 0x4f3   :  { %v337_v55 = vmul.f32 %v1076_v53, %v335_v54 }
 0x4f5   :  { %339 = vrot.lane.b32.xlu0 %v337_v55, %s1141_s16 }
 0x567   :  { %v340_v56 = vpop.permute.xlu0 %339 }
 0x568   :  { %v342_v57 = vadd.f32 %v340_v56, %v277_v48 }
 0x56a   :  { %1077 = vtanh.f32 %v342_v57 }
 0x574   :  { %v1078_v58 = vpop.eup %1077 }
 0x575   :  { %v344_v59 = vsub.f32 %v1257_v40, %v1078_v58 }
 0x577   :  { %346 = vrot.lane.b32.xlu1 %v344_v59, %s1143_s17 }
 0x5e9   :  { %v347_v62 = vpop.permute.xlu1 %346 }
 0x5ea   :  { %v349_v63 = vmul.f32 %v1076_v53, %v347_v62 }
 0x5ec   :  { %351 = vrot.lane.b32.xlu0 %v349_v63, %s1142_s3 }
 0x65e   :  { %v352_v0 = vpop.permute.xlu0 %351 }
 0x65f   :  { %v1285_v3 = vadd.f32 %v1078_v58, %v352_v0 }
 0x661   :  { %v361_v4 = vpack.c.bf16 %v1285_v3, %v1285_v3 }
 0x663   :  { %363 = vrot.lane.b32.xlu1 %v361_v4, %s1141_s16 }
 0x6d5   :  { %v364_v15 = vpop.permute.xlu1 %363 }
 0x6d6   :  { %1011 = vmatmul.mubr.msk.bf16.vlgmr.msra.gmra.mrb[8].mxu0 %vm34_vm1, %v364_v15 }
 0x6d7   :  { %1023 = vmatpush3.bf16.msra.mxu0 %v1197_v2  ;;  %1026 = vmatprep.mubr.msk.bf16.mxu0 %vm1140_vm2, %v1139_v1 }
 0x6d8   :  { %1024 = vmatprep.subr.bf16.mxu0 %v1139_v1 }
 0x6db   :  { %1025 = vmatpush3.bf16.msra.mxu0 %v1211_v5 }
 0x6dc   :  { %1038 = vmatprep.subr.bf16.mxu0 %v1139_v1 }
 0x7a9   :  { %v402_v16 = vpop.f32.mrb[8].mxu0 }
 0x7aa   :  { %v415_v9 = vadd.f32 %v402_v16, %v1248_v18  ;;  %v1012_v17 = vpop.f32.mrb[9].mxu0  ;;  %v408_v22 = vadd.f32 %v402_v16, %v360_v21 }
 0x7ab   :  { %v405_v19 = vpop.f32.mrb[10].mxu0 }
 0x7ac   :  { %417 = vrot.lane.b32.xlu0 %v415_v9, %s1141_s16  ;;  %v1013_v20 = vpop.f32.mrb[11].mxu0  ;;  %v938_v23 = vmul.f32 -1.442695, %v408_v22 }
 0x7ae   :  { %1079 = vpow2.f32 %v938_v23 }
 0x7b8   :  { %v1080_v24 = vpop.eup %1079 }
 0x7b9   :  { %v412_v25 = vadd.f32 1.0, %v1080_v24 }
 0x7bb   :  { %1081 = vrcp.f32 %v412_v25 }
 0x7c5   :  { %v1082_v26 = vpop.eup %1081 }
 0x81e   :  { %v418_v27 = vpop.permute.xlu0 %417 }
 0x81f   :  { %v420_v28 = vmul.f32 %v1082_v26, %v418_v27 }
 0x821   :  { %422 = vrot.lane.b32.xlu1 %v420_v28, %s1141_s16 }
 0x893   :  { %v423_v29 = vpop.permute.xlu1 %422 }
 0x894   :  { %v425_v30 = vadd.f32 %v423_v29, %v360_v21 }
 0x896   :  { %1083 = vtanh.f32 %v425_v30 }
 0x8a0   :  { %v1084_v31 = vpop.eup %1083 }
 0x8a1   :  { %v427_v32 = vsub.f32 %v1285_v3, %v1084_v31 }
 0x8a3   :  { %429 = vrot.lane.b32.xlu0 %v427_v32, %s1143_s17  ;;  %v609_v32 = vld [vmem:[#allocation3 + $0x28] sm:$0xff] }
 0x915   :  { %v430_v33 = vpop.permute.xlu0 %429 }
 0x916   :  { %v432_v34 = vmul.f32 %v1082_v26, %v430_v33 }
 0x918   :  { %434 = vrot.lane.b32.xlu1 %v432_v34, %s1142_s3 }
 0x98a   :  { %v435_v35 = vpop.permute.xlu1 %434 }
 0x98b   :  { %v1311_v36 = vadd.f32 %v1084_v31, %v435_v35 }
 0x98d   :  { %v444_v37 = vpack.c.bf16 %v1311_v36, %v1311_v36 }
 0x98f   :  { %446 = vrot.lane.b32.xlu0 %v444_v37, %s1141_s16 }
 0xa01   :  { %v447_v38 = vpop.permute.xlu0 %446 }
 0xa02   :  { %1019 = vmatmul.mubr.msk.bf16.vlgmr.msra.gmra.mrb[8].mxu1 %vm34_vm1, %v447_v38 }
 0xa03   :  { %1031 = vmatpush3.bf16.msra.mxu1 %v1197_v2  ;;  %1034 = vmatprep.mubr.msk.bf16.mxu1 %vm1140_vm2, %v1139_v1 }
 0xa04   :  { %1032 = vmatprep.subr.bf16.mxu1 %v1139_v1 }
 0xa07   :  { %1033 = vmatpush3.bf16.msra.mxu1 %v1211_v5 }
 0xa08   :  { %1046 = vmatprep.subr.bf16.mxu1 %v1139_v1 }
 0xad5   :  { %v485_v39 = vpop.f32.mrb[8].mxu1 }
 0xad6   :  { %v498_v41 = vadd.f32 %v485_v39, %v1248_v18  ;;  %v1020_v42 = vpop.f32.mrb[9].mxu1  ;;  %v491_v46 = vadd.f32 %v485_v39, %v443_v45 }
 0xad7   :  { %v488_v43 = vpop.f32.mrb[10].mxu1 }
 0xad8   :  { %500 = vrot.lane.b32.xlu1 %v498_v41, %s1141_s16  ;;  %v1021_v44 = vpop.f32.mrb[11].mxu1  ;;  %v940_v47 = vmul.f32 -1.442695, %v491_v46 }
 0xada   :  { %1085 = vpow2.f32 %v940_v47 }
 0xae4   :  { %v1086_v48 = vpop.eup %1085 }
 0xae5   :  { %v495_v49 = vadd.f32 1.0, %v1086_v48 }
 0xae7   :  { %1087 = vrcp.f32 %v495_v49 }
 0xaf1   :  { %v1088_v50 = vpop.eup %1087 }
 0xb4a   :  { %v501_v51 = vpop.permute.xlu1 %500 }
 0xb4b   :  { %v503_v52 = vmul.f32 %v1088_v50, %v501_v51 }
 0xb4d   :  { %505 = vrot.lane.b32.xlu0 %v503_v52, %s1141_s16 }
 0xbbf   :  { %v506_v53 = vpop.permute.xlu0 %505 }
 0xbc0   :  { %v508_v54 = vadd.f32 %v506_v53, %v443_v45 }
 0xbc2   :  { %1089 = vtanh.f32 %v508_v54  ;;  %v692_v54 = vld [vmem:[#allocation3 + $0x30] sm:$0xff] }
 0xbcc   :  { %v1090_v55 = vpop.eup %1089 }
 0xbcd   :  { %v510_v56 = vsub.f32 %v1311_v36, %v1090_v55 }
 0xbcf   :  { %512 = vrot.lane.b32.xlu1 %v510_v56, %s1143_s17 }
 0xc41   :  { %v513_v57 = vpop.permute.xlu1 %512 }
 0xc42   :  { %v515_v58 = vmul.f32 %v1088_v50, %v513_v57 }
 0xc44   :  { %517 = vrot.lane.b32.xlu0 %v515_v58, %s1142_s3 }
 0xcb6   :  { %v518_v59 = vpop.permute.xlu0 %517 }
 0xcb7   :  { %v1329_v60 = vadd.f32 %v1090_v55, %v518_v59 }
 0xcb9   :  { %v527_v61 = vpack.c.bf16 %v1329_v60, %v1329_v60 }
 0xcbb   :  { %529 = vrot.lane.b32.xlu1 %v527_v61, %s1141_s16 }
 0xd2d   :  { %v530_v62 = vpop.permute.xlu1 %529 }
 0xd2e   :  { %1027 = vmatmul.mubr.msk.bf16.vlgmr.msra.gmra.mrb[12].mxu0 %vm34_vm1, %v530_v62 }
 0xd2f   :  { %1039 = vmatpush3.bf16.msra.mxu0 %v1197_v2  ;;  %1042 = vmatprep.mubr.msk.bf16.mxu0 %vm1140_vm2, %v1139_v1 }
 0xd30   :  { %1040 = vmatprep.subr.bf16.mxu0 %v1139_v1 }
 0xd33   :  { %1041 = vmatpush3.bf16.msra.mxu0 %v1211_v5 }
 0xe01   :  { %v568_v63 = vpop.f32.mrb[12].mxu0 }
 0xe02   :  { %v581_v0 = vadd.f32 %v568_v63, %v1248_v18  ;;  %v1028_v4 = vpop.f32.mrb[13].mxu0  ;;  %v574_v10 = vadd.f32 %v568_v63, %v526_v8 }
 0xe03   :  { %v571_v6 = vpop.f32.mrb[14].mxu0 }
 0xe04   :  { %583 = vrot.lane.b32.xlu0 %v581_v0, %s1141_s16  ;;  %v1029_v7 = vpop.f32.mrb[15].mxu0  ;;  %v942_v11 = vmul.f32 -1.442695, %v574_v10 }
 0xe06   :  { %1091 = vpow2.f32 %v942_v11 }
 0xe10   :  { %v1092_v12 = vpop.eup %1091 }
 0xe11   :  { %v578_v13 = vadd.f32 1.0, %v1092_v12 }
 0xe13   :  { %1093 = vrcp.f32 %v578_v13 }
 0xe1d   :  { %v1094_v14 = vpop.eup %1093 }
 0xe76   :  { %v584_v15 = vpop.permute.xlu0 %583 }
 0xe77   :  { %v586_v16 = vmul.f32 %v1094_v14, %v584_v15 }
 0xe79   :  { %588 = vrot.lane.b32.xlu1 %v586_v16, %s1141_s16 }
 0xeeb   :  { %v589_v9 = vpop.permute.xlu1 %588 }
 0xeec   :  { %v591_v17 = vadd.f32 %v589_v9, %v526_v8 }
 0xeee   :  { %1095 = vtanh.f32 %v591_v17 }
 0xef8   :  { %v1096_v19 = vpop.eup %1095 }
 0xef9   :  { %v593_v20 = vsub.f32 %v1329_v60, %v1096_v19 }
 0xefb   :  { %595 = vrot.lane.b32.xlu0 %v593_v20, %s1143_s17 }
 0xf6d   :  { %v596_v21 = vpop.permute.xlu0 %595 }
 0xf6e   :  { %v598_v22 = vmul.f32 %v1094_v14, %v596_v21 }
 0xf70   :  { %600 = vrot.lane.b32.xlu1 %v598_v22, %s1142_s3 }
 0xfe2   :  { %v601_v23 = vpop.permute.xlu1 %600 }
 0xfe3   :  { %v1346_v24 = vadd.f32 %v1096_v19, %v601_v23  ;;  %v775_v19 = vld [vmem:[#allocation3 + $0x38] sm:$0xff] }
 0xfe5   :  { %v610_v25 = vpack.c.bf16 %v1346_v24, %v1346_v24 }
 0xfe7   :  { %612 = vrot.lane.b32.xlu0 %v610_v25, %s1141_s16 }
0x1059   :  { %v613_v26 = vpop.permute.xlu0 %612 }
0x105a   :  { %1035 = vmatmul.mubr.msk.bf16.vlgmr.msra.gmra.mrb[12].mxu1 %vm34_vm1, %v613_v26 }
0x105b   :  { %1047 = vmatpush3.bf16.msra.mxu1 %v1197_v2  ;;  %1050 = vmatprep.mubr.msk.bf16.mxu1 %vm1140_vm2, %v1139_v1 }
0x105c   :  { %1048 = vmatprep.subr.bf16.mxu1 %v1139_v1 }
0x105f   :  { %1049 = vmatpush3.bf16.msra.mxu1 %v1211_v5 }
0x112d   :  { %v651_v27 = vpop.f32.mrb[12].mxu1 }
0x112e   :  { %v664_v28 = vadd.f32 %v651_v27, %v1248_v18  ;;  %v1036_v29 = vpop.f32.mrb[13].mxu1  ;;  %v657_v33 = vadd.f32 %v651_v27, %v609_v32 }
0x112f   :  { %v654_v30 = vpop.f32.mrb[14].mxu1 }
0x1130   :  { %666 = vrot.lane.b32.xlu1 %v664_v28, %s1141_s16  ;;  %v1037_v31 = vpop.f32.mrb[15].mxu1  ;;  %v944_v34 = vmul.f32 -1.442695, %v657_v33 }
0x1132   :  { %1097 = vpow2.f32 %v944_v34 }
0x113c   :  { %v1098_v2 = vpop.eup %1097 }
0x113d   :  { %v661_v35 = vadd.f32 1.0, %v1098_v2 }
0x113f   :  { %1099 = vrcp.f32 %v661_v35 }
0x1149   :  { %v1100_v37 = vpop.eup %1099 }
0x11a2   :  { %v667_v38 = vpop.permute.xlu1 %666 }
0x11a3   :  { %v669_v1 = vmul.f32 %v1100_v37, %v667_v38 }
0x11a5   :  { %671 = vrot.lane.b32.xlu0 %v669_v1, %s1141_s16 }
0x1217   :  { %v672_v5 = vpop.permute.xlu0 %671 }
0x1218   :  { %v674_v39 = vadd.f32 %v672_v5, %v609_v32 }
0x121a   :  { %1101 = vtanh.f32 %v674_v39 }
0x1224   :  { %v1102_v41 = vpop.eup %1101 }
0x1225   :  { %v676_v42 = vsub.f32 %v1346_v24, %v1102_v41 }
0x1227   :  { %678 = vrot.lane.b32.xlu1 %v676_v42, %s1143_s17 }
0x1299   :  { %v679_v43 = vpop.permute.xlu1 %678 }
0x129a   :  { %v681_v44 = vmul.f32 %v1100_v37, %v679_v43 }
0x129c   :  { %683 = vrot.lane.b32.xlu0 %v681_v44, %s1142_s3 }
0x130e   :  { %v684_v45 = vpop.permute.xlu0 %683 }
0x130f   :  { %v1363_v46 = vadd.f32 %v1102_v41, %v684_v45 }
0x1311   :  { %v693_v47 = vpack.c.bf16 %v1363_v46, %v1363_v46 }
0x1313   :  { %695 = vrot.lane.b32.xlu1 %v693_v47, %s1141_s16 }
0x1385   :  { %v696_v48 = vpop.permute.xlu1 %695 }
0x1386   :  { %1043 = vmatmul.mubr.msk.bf16.vlgmr.msra.gmra.mrb[16].mxu0 %vm34_vm1, %v696_v48 }
0x1459   :  { %v734_v49 = vpop.f32.mrb[16].mxu0 }
0x145a   :  { %v747_v50 = vadd.f32 %v734_v49, %v1248_v18  ;;  %v1044_v51 = vpop.f32.mrb[17].mxu0  ;;  %v740_v55 = vadd.f32 %v734_v49, %v692_v54 }
0x145b   :  { %v737_v52 = vpop.f32.mrb[18].mxu0  ;;  %v950_v51 = vld [vmem:[%s1510_s6] ss:$0 sm:$0xff] }
0x145c   :  { %749 = vrot.lane.b32.xlu0 %v747_v50, %s1141_s16  ;;  %v1045_v53 = vpop.f32.mrb[19].mxu0  ;;  %v946_v56 = vmul.f32 -1.442695, %v740_v55 }
0x145e   :  { %1103 = vpow2.f32 %v946_v56 }
0x1468   :  { %v1104_v57 = vpop.eup %1103 }
0x1469   :  { %v744_v58 = vadd.f32 1.0, %v1104_v57 }
0x146b   :  { %1105 = vrcp.f32 %v744_v58 }
0x1475   :  { %v1106_v59 = vpop.eup %1105 }
0x14ce   :  { %v750_v61 = vpop.permute.xlu0 %749 }
0x14cf   :  { %v752_v62 = vmul.f32 %v1106_v59, %v750_v61 }
0x14d1   :  { %754 = vrot.lane.b32.xlu1 %v752_v62, %s1141_s16 }
0x1543   :  { %v755_v63 = vpop.permute.xlu1 %754 }
0x1544   :  { %v757_v0 = vadd.f32 %v755_v63, %v692_v54 }
0x1546   :  { %1107 = vtanh.f32 %v757_v0 }
0x1550   :  { %v1108_v4 = vpop.eup %1107 }
0x1551   :  { %v759_v6 = vsub.f32 %v1363_v46, %v1108_v4 }
0x1553   :  { %761 = vrot.lane.b32.xlu0 %v759_v6, %s1143_s17 }
0x15c5   :  { %v762_v7 = vpop.permute.xlu0 %761 }
0x15c6   :  { %v764_v8 = vmul.f32 %v1106_v59, %v762_v7 }
0x15c8   :  { %766 = vrot.lane.b32.xlu1 %v764_v8, %s1142_s3 }
0x163a   :  { %v767_v10 = vpop.permute.xlu1 %766 }
0x163b   :  { %v769_v11 = vadd.f32 %v1108_v4, %v767_v10 }
0x163d   :  { %v776_v12 = vpack.c.bf16 %v769_v11, %v769_v11 }
0x163f   :  { %778 = vrot.lane.b32.xlu0 %v776_v12, %s1141_s16 }
0x16b1   :  { %v779_v13 = vpop.permute.xlu0 %778 }
0x16b2   :  { %1051 = vmatmul.mubr.msk.bf16.vlgmr.msra.gmra.mrb[16].mxu1 %vm34_vm1, %v779_v13 }
0x1785   :  { %v817_v14 = vpop.f32.mrb[16].mxu1 }
0x1786   :  { %v830_v15 = vadd.f32 %v817_v14, %v1248_v18  ;;  %v1052_v16 = vpop.f32.mrb[17].mxu1  ;;  %v823_v20 = vadd.f32 %v817_v14, %v775_v19 }
0x1787   :  { %v820_v9 = vpop.f32.mrb[18].mxu1 }
0x1788   :  { %832 = vrot.lane.b32.xlu1 %v830_v15, %s1141_s16  ;;  %v1053_v17 = vpop.f32.mrb[19].mxu1  ;;  %v948_v21 = vmul.f32 -1.442695, %v823_v20 }
0x178a   :  { %1109 = vpow2.f32 %v948_v21 }
0x1794   :  { %v1110_v22 = vpop.eup %1109 }
0x1795   :  { %v827_v23 = vadd.f32 1.0, %v1110_v22 }
0x1797   :  { %1111 = vrcp.f32 %v827_v23 }
0x17a1   :  { %v1112_v25 = vpop.eup %1111 }
0x17fa   :  { %v833_v26 = vpop.permute.xlu1 %832 }
0x17fb   :  { %v835_v27 = vmul.f32 %v1112_v25, %v833_v26 }
0x17fd   :  { %837 = vrot.lane.b32.xlu0 %v835_v27, %s1141_s16 }
0x186f   :  { %v838_v28 = vpop.permute.xlu0 %837 }
0x1870   :  { %v840_v29 = vadd.f32 %v838_v28, %v775_v19 }
0x1872   :  { %1113 = vtanh.f32 %v840_v29 }
0x187c   :  { %v1114_v18 = vpop.eup %1113 }
0x187d   :  { %v842_v30 = vsub.f32 %v769_v11, %v1114_v18 }
0x187f   :  { %844 = vrot.lane.b32.xlu1 %v842_v30, %s1143_s17  ;;  %s1115_s17 = scalar_lea.vmem %s911_s2, 128 }
0x1880   :  { %p1116_p0 = scmp.ne.s32.totalorder %s911_s2, %s1115_s17  ;;  %p1121_p2 = scmp.lt.s32.totalorder %s1115_s17, %s1115_s17 }
0x1882   :  { %p1122_p3 = por %p1121_p2, %p1120_p1 }
0x1883   :  { %273 = vrot.lane.b32.xlu1 %v1257_v40, %s1141_s16 }
0x1884   :  { %p1123_p4 = pnand %p1122_p3, %p1116_p0 }
0x1887   :  { %439 = vrot.lane.b32.xlu1 %v1311_v36, %s1141_s16  ;;  %v949_v36 = vld [vmem:[%s1509_s5] ss:$0 sm:$0xff] }
0x188b   :  { %605 = vrot.lane.b32.xlu1 %v1346_v24, %s1141_s16 }
0x188f   :  { %771 = vrot.lane.b32.xlu1 %v769_v11, %s1141_s16 }
0x18f1   :  { %v845_v31 = vpop.permute.xlu1 %844 }
0x18f2   :  { %v847_v32 = vmul.f32 %v1112_v25, %v845_v31 }
0x18f4   :  { %849 = vrot.lane.b32.xlu0 %v847_v32, %s1142_s3 }
0x18f5   :  { %v274_v33 = vpop.permute.xlu1 %273 }
0x18f6   :  { %276 = vst.msk [vmem:[%s1511_s7] sm:$0xff] %vm34_vm1, %v274_v33 }
0x18f8   :  { %356 = vrot.lane.b32.xlu0 %v1285_v3, %s1141_s16 }
0x18f9   :  { %v440_v40 = vpop.permute.xlu1 %439 }
0x18fa   :  { %442 = vst.msk [vmem:[%s1511_s7 + $0x10] sm:$0xff] %vm34_vm1, %v440_v40 }
0x18fc   :  { %522 = vrot.lane.b32.xlu0 %v1329_v60, %s1141_s16 }
0x18fd   :  { %v859_v24 = vld [vmem:[%s1511_s7] sm:$0xff]  ;;  %v606_v34 = vpop.permute.xlu1 %605 }
0x18fe   :  { %v874_v2 = vmul.f32 %v949_v36, %v859_v24  ;;  %608 = vst.msk [vmem:[%s1511_s7 + $0x20] sm:$0xff] %vm34_vm1, %v606_v34 }
0x1900   :  { %882 = vst.msk [vmem:[%s1511_s7] sm:$0xff] %vm34_vm1, %v874_v2  ;;  %688 = vrot.lane.b32.xlu0 %v1363_v46, %s1141_s16 }
0x1901   :  { %v861_v3 = vld [vmem:[%s1511_s7 + $0x10] sm:$0xff]  ;;  %v772_v60 = vpop.permute.xlu1 %771 }
0x1902   :  { %v876_v35 = vmul.f32 %v949_v36, %v861_v3  ;;  %774 = vst.msk [vmem:[%s1511_s7 + $0x30] sm:$0xff] %vm34_vm1, %v772_v60 }
0x1904   :  { %884 = vst.msk [vmem:[%s1511_s7 + $0x10] sm:$0xff] %vm34_vm1, %v876_v35 }
0x1905   :  { %v863_v37 = vld [vmem:[%s1511_s7 + $0x20] sm:$0xff] }
0x1906   :  { %v878_v38 = vmul.f32 %v949_v36, %v863_v37 }
0x1908   :  { %886 = vst.msk [vmem:[%s1511_s7 + $0x20] sm:$0xff] %vm34_vm1, %v878_v38 }
0x1909   :  { %v865_v1 = vld [vmem:[%s1511_s7 + $0x30] sm:$0xff] }
0x190a   :  { %v880_v5 = vmul.f32 %v949_v36, %v865_v1 }
0x190c   :  { %888 = vst.msk [vmem:[%s1511_s7 + $0x30] sm:$0xff] %vm34_vm1, %v880_v5 }
0x1966   :  { %v850_v39 = vpop.permute.xlu0 %849 }
0x1967   :  { %v852_v41 = vadd.f32 %v1114_v18, %v850_v39 }
0x1969   :  { %854 = vrot.lane.b32.xlu0 %v852_v41, %s1141_s16 }
0x196a   :  { %v357_v42 = vpop.permute.xlu0 %356 }
0x196b   :  { %359 = vst.msk [vmem:[%s1511_s7 + $0x8] sm:$0xff] %vm34_vm1, %v357_v42 }
0x196e   :  { %v523_v43 = vpop.permute.xlu0 %522 }
0x196f   :  { %525 = vst.msk [vmem:[%s1511_s7 + $0x18] sm:$0xff] %vm34_vm1, %v523_v43 }
0x1972   :  { %v860_v44 = vld [vmem:[%s1511_s7 + $0x8] sm:$0xff]  ;;  %v689_v45 = vpop.permute.xlu0 %688 }
0x1973   :  { %v875_v46 = vmul.f32 %v949_v36, %v860_v44  ;;  %691 = vst.msk [vmem:[%s1511_s7 + $0x28] sm:$0xff] %vm34_vm1, %v689_v45 }
0x1975   :  { %883 = vst.msk [vmem:[%s1511_s7 + $0x8] sm:$0xff] %vm34_vm1, %v875_v46 }
0x1976   :  { %v862_v47 = vld [vmem:[%s1511_s7 + $0x18] sm:$0xff] }
0x1977   :  { %v877_v48 = vmul.f32 %v949_v36, %v862_v47 }
0x1979   :  { %885 = vst.msk [vmem:[%s1511_s7 + $0x18] sm:$0xff] %vm34_vm1, %v877_v48 }
0x197a   :  { %v864_v49 = vld [vmem:[%s1511_s7 + $0x28] sm:$0xff] }
0x197b   :  { %v879_v50 = vmul.f32 %v949_v36, %v864_v49 }
0x197d   :  { %887 = vst.msk [vmem:[%s1511_s7 + $0x28] sm:$0xff] %vm34_vm1, %v879_v50 }
0x19db   :  { %v855_v52 = vpop.permute.xlu0 %854 }
0x19dc   :  { %857 = vst.msk [vmem:[%s1511_s7 + $0x38] sm:$0xff] %vm34_vm1, %v855_v52  ;;  %858 = vst.msk [vmem:[#allocation2] sm:$0xff] %vm34_vm1, %v855_v52  ;;  %v900_v53 = vmul.f32 %v950_v51, %v855_v52 }
0x19de   :  { %901 = vst.msk [vmem:[#allocation4] sm:$0xff] %vm34_vm1, %v900_v53 }
0x19df   :  { %1126 = shalt.err (!%p1123_p4)
}
0x19e0   :  { %s1127_s19 = scalar_lea.hbm %s1512_s8, 128 }
0x19e1   :  { %p1128_p5 = scmp.ne.s32.totalorder %s1512_s8, %s1127_s19  ;;  %p1131_p6 = scmp.lt.u32.totalorder %s1127_s19, %s1512_s8 }
0x19e3   :  { %p1133_p7 = pnand %p1131_p6, %p1128_p5 }
0x19e5   :  { %1136 = shalt.err (!%p1133_p7)
}
0x19e6   :  { %913 = dma.vmem_to_hbm [thread:$0]  %s911_s2, 128, %s1512_s8, [#allocation5]   ;;  %v866_v54 = vld [vmem:[%s1511_s7 + $0x38] sm:$0xff] }
0x19e7   :  { %v881_v55 = vmul.f32 %v949_v36, %v866_v54 }
0x19e9   :  { %889 = vst.msk [vmem:[%s1511_s7 + $0x38] sm:$0xff] %vm34_vm1, %v881_v55 }
0x19ea   :  { %1137 = dma.done.wait [#allocation5], 128  }
0x19eb   :  { %1138 = vsyncadd [#allocation5], 4294967168 }
0x19ec   :  { %919 = vsyncpa [#allocation5], 1 }

</bundles_post_ra>
